<compile_context>
chip_gen: v5e
topology: v5e:2x2
jax: 0.10.0
libtpu: 0.0.40
codegen_flags: <defaults>
</compile_context>

<pallas_src>
import functools

import numpy as np

import jax
import jax.numpy as jnp
from jax.experimental import pallas as pl
from jax.experimental.pallas import tpu as pltpu


def _round_up(x, m):
    return (x + m - 1) // m * m


def _pad2(x, rows, cols):
    r, c = x.shape
    if (int(r), int(c)) == (rows, cols):
        return x                                   # skip the padding copy when aligned
    return jnp.zeros((rows, cols), x.dtype).at[:r, :c].set(x)


def _vmem_limit(vmem_needed):
    try:
        cap = int(pltpu.get_tpu_info().vmem_capacity_bytes)
    except Exception:                              # noqa: BLE001 - conservative fallback
        cap = 64 << 20                             # v7x per-core VMEM
    limit = int(vmem_needed * 1.25) + (2 << 20)    # real need + ~25% + compiler headroom
    return int(max(min(limit, int(cap * 0.75)), 16 << 20))


# ----------------------------------------------------------------------------
# counts helper shared by the matmul paths
# ----------------------------------------------------------------------------
def _bag_counts(idx, vstart, tv, dtype):
    """Per-bag index counts restricted to the vocab window [vstart, vstart+tv).

    idx: (tb, n) int32.  Returns (tb, tv) counts in `dtype`.  The window shift
    is applied to the small (tb, n) tile and the compares accumulate directly
    in the matmul dtype (exact for n <= 256 in bf16); no (tb, n, tv) intermediate.
    """
    tb, n = idx.shape
    idx_local = idx - vstart
    iota_v = jax.lax.broadcasted_iota(jnp.int32, (tb, tv), 1)
    counts = jnp.zeros((tb, tv), dtype)
    for j in range(n):                             # n is static and small
        counts = counts + (idx_local[:, j:j + 1] == iota_v).astype(dtype)
    return counts


# ----------------------------------------------------------------------------
# Path 1: small vocab, whole table resident in VMEM.  grid = (bag tiles,)
# ----------------------------------------------------------------------------
def _resident_kernel(idx_ref, *rest, n_w, mode, bag_size, counts_dtype):
    w_refs, o_ref = rest[:n_w], rest[n_w]
    counts = _bag_counts(idx_ref[...], 0, w_refs[0].shape[0], counts_dtype)
    out = jnp.dot(counts, w_refs[0][...], preferred_element_type=jnp.float32)
    for r in w_refs[1:]:                           # bf16 lo-part matmul (hi/lo split)
        out = out + jnp.dot(counts, r[...], preferred_element_type=jnp.float32)
    if mode == "mean":
        out = out * (1.0 / float(bag_size))
    o_ref[...] = out.astype(o_ref.dtype)


# ----------------------------------------------------------------------------
# Path 2: streamed vocab.  grid = (bag tiles "parallel", vocab tiles "arbitrary")
# ----------------------------------------------------------------------------
def _stream_kernel(idx_ref, *rest, n_w, mode, bag_size, counts_dtype):
    w_refs, o_ref, acc_ref = rest[:n_w], rest[n_w], rest[n_w + 1]
    k = pl.program_id(1)
    tv = w_refs[0].shape[0]

    @pl.when(k == 0)
    def _init():
        acc_ref[...] = jnp.zeros_like(acc_ref)

    counts = _bag_counts(idx_ref[...], k * tv, tv, counts_dtype)
    part = jnp.dot(counts, w_refs[0][...], preferred_element_type=jnp.float32)
    for r in w_refs[1:]:
        part = part + jnp.dot(counts, r[...], preferred_element_type=jnp.float32)
    acc_ref[...] += part

    @pl.when(k == pl.num_programs(1) - 1)
    def _finalize():
        out = acc_ref[...]
        if mode == "mean":
            out = out * (1.0 / float(bag_size))
        o_ref[...] = out.astype(o_ref.dtype)


# ----------------------------------------------------------------------------
# Path 3: large vocab, table stays in HBM, scalar-prefetch DMA row gather.
# grid = (bag tiles,), cross-step double-buffered row fetches ("arbitrary").
# ----------------------------------------------------------------------------
def _gather_kernel(idx_ref, w_hbm, o_ref, rows, sems, *, mode, bag_size, tbg):
    # idx_ref : SMEM (Bp*N,) int32 (scalar prefetch, flat so SMEM padding stays small)
    # w_hbm   : (V, Dp) f32 in HBM (memory_space=pl.ANY)
    # o_ref   : (tbg, Dp) f32 output tile
    # rows    : VMEM (2, tbg, N, Dp) f32 gather buffer (double-buffered across steps)
    # sems    : DMA semaphores (2, tbg, N)
    i = pl.program_id(0)
    n = bag_size

    def start_fetch(tile, slot):
        base = tile * (tbg * n)
        for b in range(tbg):
            for j in range(n):
                row = idx_ref[base + b * n + j]
                pltpu.make_async_copy(
                    w_hbm.at[pl.ds(row, 1), :],
                    rows.at[slot, b, pl.ds(j, 1), :],
                    sems.at[slot, b, j],
                ).start()

    @pl.when(i == 0)
    def _prime():
        start_fetch(0, 0)

    slot = i % 2

    @pl.when(i + 1 < pl.num_programs(0))
    def _prefetch_next():
        start_fetch(i + 1, 1 - slot)

    for b in range(tbg):
        for j in range(n):
            pltpu.make_async_copy(
                w_hbm.at[pl.ds(0, 1), :],          # same-sized descriptor for the wait
                rows.at[slot, b, pl.ds(j, 1), :],
                sems.at[slot, b, j],
            ).wait()

    red = jnp.sum(rows[slot], axis=1)              # (tbg, Dp) f32, exact
    if mode == "mean":
        red = red * (1.0 / float(n))
    o_ref[...] = red.astype(o_ref.dtype)


# ----------------------------------------------------------------------------
# Wrapper
# ----------------------------------------------------------------------------
def embedding_bag(indices, weight, offsets=None, mode="mean", *,
                  impl="auto", precision="hilo",
                  tile_b=256, tile_v=1024, gather_tile_b=8):
    """Pallas EmbeddingBag forward.

    indices : (B, N) int bags, or 1-D (M,) with equally spaced `offsets` (B,).
    weight  : (V, D) float32 embedding table.
    mode    : 'sum' | 'mean'.
    impl    : 'auto' | 'resident' | 'stream' | 'gather'.
    precision (matmul paths only): 'hilo' (two bf16 matmuls, near-f32, default),
              'bf16' (fast, ~1e-3 rel error), 'f32' (exact, slow multi-pass MXU).
              The gather path is always exact f32.
    Returns : (B, D) float32.
    """
    if mode not in ("sum", "mean"):
        raise NotImplementedError("only mode='sum'|'mean' supported")  # TODO(synk): mode='max'
    indices = jnp.asarray(indices, dtype=jnp.int32)
    weight = jnp.asarray(weight, dtype=jnp.float32)

    if indices.ndim == 1:
        if offsets is None:
            raise ValueError("1-D input requires offsets")
        off = np.asarray(jax.device_get(jnp.asarray(offsets, jnp.int32)))
        b = int(off.shape[0])
        total = int(indices.shape[0])
        n = total // max(b, 1)
        if b == 0 or n * b != total or not np.array_equal(off, np.arange(b, dtype=off.dtype) * n):
            # TODO(synk): ragged (non-uniform) bags are not supported.
            raise NotImplementedError("only uniformly spaced offsets (equal-length bags) supported")
        indices = indices.reshape(b, n)

    B, N = map(int, indices.shape)
    V, D = map(int, weight.shape)
    Dp = _round_up(D, 128)                         # lane-dense output / weight rows
    Vp128 = _round_up(V, 128)

    # ---- choose implementation -------------------------------------------
    per_elem = {"f32": 4, "bf16": 2, "hilo": 4}[precision]
    table_bytes = Vp128 * Dp * per_elem
    if impl == "auto":
        if table_bytes <= (8 << 20):               # fits (double-buffered) even on v7x
            impl = "resident"
        elif V >= 8 * tile_b * N:                  # re-streaming the table clearly loses
            impl = "gather"
        else:
            impl = "stream"

    # ---- large-V path: HBM row gather (exact, ignores `precision`) --------
    if impl == "gather":
        tbg = max(8, _round_up(min(gather_tile_b, _round_up(B, 8)), 8))
        Bp = _round_up(B, tbg)
        w_p = weight if D == Dp else _pad2(weight, V, Dp)   # no V padding needed
        flat = indices.reshape(-1)
        idx_flat = flat if Bp == B else jnp.zeros((Bp * N,), jnp.int32).at[:B * N].set(flat)
        vmem_needed = 2 * (tbg * Dp * 4) + 2 * (tbg * N * Dp * 4) + (1 << 20)
        kernel = functools.partial(_gather_kernel, mode=mode, bag_size=N, tbg=tbg)
        out = pl.pallas_call(
            kernel,
            out_shape=jax.ShapeDtypeStruct((Bp, Dp), jnp.float32),
            grid_spec=pltpu.PrefetchScalarGridSpec(
                num_scalar_prefetch=1,
                grid=(Bp // tbg,),
                in_specs=[pl.BlockSpec(memory_space=pl.ANY)],       # table stays in HBM
                out_specs=pl.BlockSpec((tbg, Dp), lambda i, idx: (i, 0)),
                scratch_shapes=[pltpu.VMEM((2, tbg, N, Dp), jnp.float32),
                                pltpu.SemaphoreType.DMA((2, tbg, N))],
            ),
            compiler_params=pltpu.CompilerParams(
                # cross-grid-step double buffering -> keep the axis on one core
                dimension_semantics=("arbitrary",),
                vmem_limit_bytes=_vmem_limit(vmem_needed)),
        )(idx_flat, w_p)
        return out[:B, :D]

    # ---- matmul paths: weight operands & counts dtype ----------------------
    if precision == "f32":
        w_ops, w_itemsize = [weight], 4
    elif precision == "bf16":
        w_ops, w_itemsize = [weight.astype(jnp.bfloat16)], 2
    elif precision == "hilo":
        w_hi = weight.astype(jnp.bfloat16)
        w_lo = (weight - w_hi.astype(jnp.float32)).astype(jnp.bfloat16)
        w_ops, w_itemsize = [w_hi, w_lo], 2
    else:
        raise ValueError("precision must be 'hilo' | 'bf16' | 'f32'")
    n_w = len(w_ops)
    # counts <= N are exact in bf16 for N <= 256; otherwise fall back to f32 counts.
    counts_dtype = jnp.bfloat16 if (w_itemsize == 2 and N <= 256) else jnp.float32

    # bag tile: large by default, but keep >= 2 tiles when possible so the
    # "parallel" bag axis can be sharded across both v7x TensorCores.
    tb = min(tile_b, _round_up(B, 8))
    if B > 8 and _round_up(B, tb) // tb < 2:
        tb = _round_up((B + 1) // 2, 8)
    Bp = _round_up(B, tb)
    idx_p = _pad2(indices, Bp, N)

    if impl == "resident":
        Vp = Vp128
        w_p = [_pad2(w, Vp, Dp) for w in w_ops]
        vmem_needed = 2 * (tb * N * 4) + 2 * n_w * Vp * Dp * w_itemsize + 2 * (tb * Dp * 4)
        kernel = functools.partial(_resident_kernel, n_w=n_w, mode=mode,
                                   bag_size=N, counts_dtype=counts_dtype)
        out = pl.pallas_call(
            kernel,
            out_shape=jax.ShapeDtypeStruct((Bp, Dp), jnp.float32),
            grid_spec=pltpu.PrefetchScalarGridSpec(
                num_scalar_prefetch=0,
                grid=(Bp // tb,),
                in_specs=[pl.BlockSpec((tb, N), lambda i: (i, 0))]
                         + [pl.BlockSpec((Vp, Dp), lambda i: (0, 0))] * n_w,
                out_specs=pl.BlockSpec((tb, Dp), lambda i: (i, 0)),
            ),
            compiler_params=pltpu.CompilerParams(
                dimension_semantics=("parallel",),
                vmem_limit_bytes=_vmem_limit(vmem_needed)),
        )(idx_p, *w_p)
        return out[:B, :D]

    if impl != "stream":
        raise ValueError("impl must be 'auto' | 'resident' | 'stream' | 'gather'")

    tv = min(_round_up(tile_v, 128), Vp128)        # vocab tile: multiple of 128 (lanes / MXU K)
    Vp = _round_up(V, tv)
    w_p = [_pad2(w, Vp, Dp) for w in w_ops]
    vmem_needed = (2 * (tb * N * 4) + 2 * n_w * tv * Dp * w_itemsize
                   + 2 * (tb * Dp * 4) + tb * Dp * 4)
    kernel = functools.partial(_stream_kernel, n_w=n_w, mode=mode,
                               bag_size=N, counts_dtype=counts_dtype)
    out = pl.pallas_call(
        kernel,
        out_shape=jax.ShapeDtypeStruct((Bp, Dp), jnp.float32),
        grid_spec=pltpu.PrefetchScalarGridSpec(
            num_scalar_prefetch=0,
            grid=(Bp // tb, Vp // tv),             # (bags "parallel", vocab "arbitrary")
            in_specs=[pl.BlockSpec((tb, N), lambda i, k: (i, 0))]
                     + [pl.BlockSpec((tv, Dp), lambda i, k: (k, 0))] * n_w,
            # NOTE: add pipeline_mode=pl.Buffered(3) on the weight slabs if profiling
            # shows the per-step slab DMA exposed behind the matmul.
            out_specs=pl.BlockSpec((tb, Dp), lambda i, k: (i, 0)),
            scratch_shapes=[pltpu.VMEM((tb, Dp), jnp.float32)],
        ),
        compiler_params=pltpu.CompilerParams(
            dimension_semantics=("parallel", "arbitrary"),
            vmem_limit_bytes=_vmem_limit(vmem_needed)),
    )(idx_p, *w_p)
    return out[:B, :D]


# ----------------------------------------------------------------------------
# Reference & tests
# ----------------------------------------------------------------------------
def _reference(indices, weight, offsets=None, mode="mean"):
    indices = jnp.asarray(indices, jnp.int32)
    if indices.ndim == 1:
        b = int(offsets.shape[0])
        indices = indices.reshape(b, indices.shape[0] // b)
    emb = jnp.take(jnp.asarray(weight, jnp.float32), indices, axis=0)   # (B, N, D)
    return jnp.sum(emb, axis=1) if mode == "sum" else jnp.mean(emb, axis=1)


if __name__ == "__main__":
    key = jax.random.PRNGKey(0)
    k_w, k_i1, k_i3, k_rest = jax.random.split(key, 4)

    # Case 1: small vocab -> resident-table fast path, 2-D fixed-length bags, mean
    V1, D1, B1, N1 = 16, 32, 10, 4
    w1 = jax.random.normal(k_w, (V1, D1), dtype=jnp.float32)   # ~ reset_parameters()
    idx1 = jax.random.randint(k_i1, (B1, N1), 0, V1, dtype=jnp.int32)
    out1 = jax.block_until_ready(embedding_bag(idx1, w1, mode="mean"))          # hilo bf16
    ref1 = _reference(idx1, w1, mode="mean")
    assert out1.shape == (B1, D1)
    assert jnp.allclose(out1, ref1, atol=2e-3, rtol=2e-3)
    out1_f32 = jax.block_until_ready(embedding_bag(idx1, w1, mode="mean", precision="f32"))
    assert jnp.allclose(out1_f32, ref1, atol=1e-5, rtol=1e-5)

    # Case 2: 1-D input + offsets (docstring example style), mode='sum'
    idx2 = jnp.array([1, 2, 4, 5, 4, 3, 2, 9], dtype=jnp.int32)
    off2 = jnp.array([0, 4], dtype=jnp.int32)
    out2 = jax.block_until_ready(embedding_bag(idx2, w1, offsets=off2, mode="sum"))
    ref2 = _reference(idx2, w1, offsets=off2, mode="sum")
    assert out2.shape == (2, D1)
    assert jnp.allclose(out2, ref2, atol=2e-3, rtol=2e-3)

    # Case 3: streamed-vocab path (forced), bf16 hi/lo split on the MXU
    V3, D3, B3, N3 = 600, 64, 12, 3
    k_w3, k_idx3 = jax.random.split(k_i3)
    w3 = jax.random.normal(k_w3, (V3, D3), dtype=jnp.float32)
    idx3 = jax.random.randint(k_idx3, (B3, N3), 0, V3, dtype=jnp.int32)
    out3 = jax.block_until_ready(
        embedding_bag(idx3, w3, mode="mean", impl="stream", tile_v=256))
    ref3 = _reference(idx3, w3, mode="mean")
    assert jnp.allclose(out3, ref3, atol=2e-3, rtol=2e-3)

    # Case 4: HBM row-gather path (forced), exact f32, mode='sum'
    V4, D4, B4, N4 = 300, 96, 9, 5
    k_w4, k_idx4 = jax.random.split(k_rest)
    w4 = jax.random.normal(k_w4, (V4, D4), dtype=jnp.float32)
    idx4 = jax.random.randint(k_idx4, (B4, N4), 0, V4, dtype=jnp.int32)
    out4 = jax.block_until_ready(embedding_bag(idx4, w4, mode="sum", impl="gather"))
    ref4 = _reference(idx4, w4, mode="sum")
    assert out4.shape == (B4, D4)
    assert jnp.allclose(out4, ref4, atol=1e-5, rtol=1e-5)

    print("KERNEL_OK")
</pallas_src>

<mosaic_0001>
module attributes {stable_mosaic.version = 11 : i64} {
  func.func @_resident_kernel(%arg0: i32, %arg1: memref<8x4xi32, #tpu.memory_space<vmem>>, %arg2: memref<128x128xbf16, #tpu.memory_space<vmem>>, %arg3: memref<128x128xbf16, #tpu.memory_space<vmem>>, %arg4: memref<8x128xf32, #tpu.memory_space<vmem>>) attributes {dimension_semantics = [#tpu.dimension_semantics<parallel>], iteration_bounds = array<i64: 2>, scalar_prefetch = 0 : i64, scratch_operands = 0 : i64, tpu.core_type = #tpu.core_type<tc>, window_params = [{transform_indices = @transform_0, window_bounds = array<i64: 8, 4>}, {pipeline_mode = #tpu.pipeline_mode<synchronous>, transform_indices = @transform_1, window_bounds = array<i64: 128, 128>}, {pipeline_mode = #tpu.pipeline_mode<synchronous>, transform_indices = @transform_2, window_bounds = array<i64: 128, 128>}, {transform_indices = @transform_3, window_bounds = array<i64: 8, 128>}]} {
    %c0 = arith.constant 0 : index
    %c0_0 = arith.constant 0 : index
    %0 = vector.load %arg1[%c0, %c0_0] : memref<8x4xi32, #tpu.memory_space<vmem>>, vector<8x4xi32>
    %c0_i32 = arith.constant 0 : i32
    %1 = vector.broadcast %c0_i32 : i32 to vector<8x4xi32>
    %2 = arith.subi %0, %1 : vector<8x4xi32>
    %3 = tpu.iota {dimensions = array<i32: 1>} : vector<8x128xi32>
    %cst = arith.constant 0.000000e+00 : bf16
    %4 = vector.broadcast %cst : bf16 to vector<8x128xbf16>
    %5 = vector.extract_strided_slice %2 {offsets = [0, 0], sizes = [8, 1], strides = [1, 1]} : vector<8x4xi32> to vector<8x1xi32>
    %6 = vector.broadcast %5 : vector<8x1xi32> to vector<8x128xi32>
    %7 = arith.cmpi eq, %6, %3 : vector<8x128xi32>
    %8 = arith.extui %7 : vector<8x128xi1> to vector<8x128xi32>
    %9 = arith.sitofp %8 : vector<8x128xi32> to vector<8x128xf32>
    %10 = arith.truncf %9 : vector<8x128xf32> to vector<8x128xbf16>
    %11 = arith.addf %4, %10 : vector<8x128xbf16>
    %12 = vector.extract_strided_slice %2 {offsets = [0, 1], sizes = [8, 1], strides = [1, 1]} : vector<8x4xi32> to vector<8x1xi32>
    %13 = vector.broadcast %12 : vector<8x1xi32> to vector<8x128xi32>
    %14 = arith.cmpi eq, %13, %3 : vector<8x128xi32>
    %15 = arith.extui %14 : vector<8x128xi1> to vector<8x128xi32>
    %16 = arith.sitofp %15 : vector<8x128xi32> to vector<8x128xf32>
    %17 = arith.truncf %16 : vector<8x128xf32> to vector<8x128xbf16>
    %18 = arith.addf %11, %17 : vector<8x128xbf16>
    %19 = vector.extract_strided_slice %2 {offsets = [0, 2], sizes = [8, 1], strides = [1, 1]} : vector<8x4xi32> to vector<8x1xi32>
    %20 = vector.broadcast %19 : vector<8x1xi32> to vector<8x128xi32>
    %21 = arith.cmpi eq, %20, %3 : vector<8x128xi32>
    %22 = arith.extui %21 : vector<8x128xi1> to vector<8x128xi32>
    %23 = arith.sitofp %22 : vector<8x128xi32> to vector<8x128xf32>
    %24 = arith.truncf %23 : vector<8x128xf32> to vector<8x128xbf16>
    %25 = arith.addf %18, %24 : vector<8x128xbf16>
    %26 = vector.extract_strided_slice %2 {offsets = [0, 3], sizes = [8, 1], strides = [1, 1]} : vector<8x4xi32> to vector<8x1xi32>
    %27 = vector.broadcast %26 : vector<8x1xi32> to vector<8x128xi32>
    %28 = arith.cmpi eq, %27, %3 : vector<8x128xi32>
    %29 = arith.extui %28 : vector<8x128xi1> to vector<8x128xi32>
    %30 = arith.sitofp %29 : vector<8x128xi32> to vector<8x128xf32>
    %31 = arith.truncf %30 : vector<8x128xf32> to vector<8x128xbf16>
    %32 = arith.addf %25, %31 : vector<8x128xbf16>
    %c0_1 = arith.constant 0 : index
    %c0_2 = arith.constant 0 : index
    %33 = vector.load %arg2[%c0_1, %c0_2] : memref<128x128xbf16, #tpu.memory_space<vmem>>, vector<128x128xbf16>
    %cst_3 = arith.constant dense<0.000000e+00> : vector<8x128xf32>
    %34 = tpu.matmul %32, %33, %cst_3 {dimension_numbers = #tpu.dot_dimension_numbers<[1], [0], [0], [1], [0, 0, 1, 1], [], []>} : vector<8x128xbf16>, vector<128x128xbf16>, vector<8x128xf32> -> vector<8x128xf32>
    %c0_4 = arith.constant 0 : index
    %c0_5 = arith.constant 0 : index
    %35 = vector.load %arg3[%c0_4, %c0_5] : memref<128x128xbf16, #tpu.memory_space<vmem>>, vector<128x128xbf16>
    %cst_6 = arith.constant dense<0.000000e+00> : vector<8x128xf32>
    %36 = tpu.matmul %32, %35, %cst_6 {dimension_numbers = #tpu.dot_dimension_numbers<[1], [0], [0], [1], [0, 0, 1, 1], [], []>} : vector<8x128xbf16>, vector<128x128xbf16>, vector<8x128xf32> -> vector<8x128xf32>
    %37 = arith.addf %34, %36 : vector<8x128xf32>
    %cst_7 = arith.constant 2.500000e-01 : f32
    %38 = vector.broadcast %cst_7 : f32 to vector<8x128xf32>
    %39 = arith.mulf %37, %38 : vector<8x128xf32>
    %c0_8 = arith.constant 0 : index
    %c0_9 = arith.constant 0 : index
    %40 = vector.load %arg4[%c0_8, %c0_9] : memref<8x128xf32, #tpu.memory_space<vmem>>, vector<8x128xf32>
    tpu.vector_store %arg4[%c0_8, %c0_9], %39 {strides = array<i32>} : memref<8x128xf32, #tpu.memory_space<vmem>>, vector<8x128xf32>,
    return
  }
  func.func @transform_0(%arg0: i32) -> (i32, i32) {
    %c0_i32 = arith.constant 0 : i32
    %c0_i32_0 = arith.constant 0 : i32
    return %arg0, %c0_i32 : i32, i32
  }
  func.func @transform_1(%arg0: i32) -> (i32, i32) {
    %c0_i32 = arith.constant 0 : i32
    %c0_i32_0 = arith.constant 0 : i32
    %c0_i32_1 = arith.constant 0 : i32
    return %c0_i32, %c0_i32_0 : i32, i32
  }
  func.func @transform_2(%arg0: i32) -> (i32, i32) {
    %c0_i32 = arith.constant 0 : i32
    %c0_i32_0 = arith.constant 0 : i32
    %c0_i32_1 = arith.constant 0 : i32
    return %c0_i32, %c0_i32_0 : i32, i32
  }
  func.func @transform_3(%arg0: i32) -> (i32, i32) {
    %c0_i32 = arith.constant 0 : i32
    %c0_i32_0 = arith.constant 0 : i32
    return %arg0, %c0_i32 : i32, i32
  }
}

</mosaic_0001>

<bundles_post_ra>
// kernel: tpu_custom_call.1
= control target key start
LH: loop header
LB: loop body
LE: loop exit
PB: predicated region body
PF: predicated region fallthrough
CT: control target
= control target key end

     0   :  { %8 = vsyncpa [#allocation3], 0  ;;  %s940_s0 = inlined_call_operand.vmem [shape: s32[16,4], index: 0, kind: input, shape index: {}]   ;;  %s941_s1 = inlined_call_operand.hbm [shape: bf16[128,128], index: 1, kind: input, shape index: {}]   ;;  %s942_s2 = inlined_call_operand.hbm [shape: bf16[128,128], index: 2, kind: input, shape index: {}]   ;;  %s943_s3 = inlined_call_operand.hbm [shape: f32[16,128], index: 3, kind: output, shape index: {}]  }
   0x1   :  { %9 = vsyncpa [#allocation6], 0 }
   0x2   :  { %10 = vsyncpa [#allocation4], 0 }
   0x3   :  { %12 = vsyncpa [#allocation4 + $0x1], 0  ;;  %s830_s12 = smov 0   ;;  %s832_s13 = smov 0  }
   0x4   :  { %s834_s14 = smov 0   ;;  %s836_s15 = smov 0  }
   0x5 LB: > { %s851_s16 = sadd.s32 4294967295, %s799_s15   ;;  %s499_s17 = sadd.s32 4294967294, %s799_s15   ;;  %s799_s15 = sphi %s836_s15, %s950_s15   ;;  %s795_s14 = sphi %s834_s14, %s949_s14   ;;  %s791_s13 = sphi %s832_s13, %s948_s13   ;;  %s787_s12 = sphi %s830_s12, %s947_s12  }
   0x6   : > { %s855_s18 = sadd.s32 1, %s799_s15   ;;  %s93_s19 = sadd.s32 1, %s795_s14 }
   0x7   : > { %s90_s20 = ssub.s32 %s799_s15, %s855_s18  ;;  %p103_p0 = scmp.ne.s32.totalorder %s795_s14, %s791_s13 }
   0x8   : > { %p91_p1 = scmp.eq.s32.totalorder %s90_s20, 0  ;;  %p104_p2 = scmp.eq.s32.totalorder %s851_s16, 1 }
   0x9   : > { %p109_p3 = scmp.ne.s32.totalorder %s791_s13, %s787_s12  ;;  %p110_p4 = scmp.eq.s32.totalorder %s499_s17, 1 }
   0xa   : > { %s866_s21 = scalar_select %p91_p1, %s795_s14, %s93_s19  }
   0xb   : > { %p868_p5 = por %p104_p2, %p103_p0  ;;  %p872_p6 = por %p110_p4, %p109_p3 }
   0xc   : > { %p500_p7 = scmp.ge.s32.totalorder %s799_s15, 1  ;;  %p117_p8 = scmp.lt.s32.totalorder %s799_s15, 3 }
   0xd   : > { %p618_p9 = scmp.eq.s32.totalorder %s851_s16, 0  ;;  %s128_s27 = sshll.u32 %s941_s1, 4  ;;  %s129_s27 = int_to_ptr.hbm [resolvable:$true] %s128_s27 }
   0xe   : > { %p879_p10 = pnand %p500_p7, %p117_p8  ;;  %s801_s28 = smov [#allocation2]  }
   0xf   : > { %s130_s29 = sshll.u32 %s801_s28, 4  ;;  %s142_s5 = sshll.u32 %s942_s2, 4  ;;  %s131_s29 = int_to_ptr.vmem [resolvable:$true] %s130_s29  ;;  %s143_s5 = int_to_ptr.hbm [resolvable:$true] %s142_s5 }
  0x10   : > { %p607_p11 = pneg %p879_p10  ;;  %s802_s6 = smov 64  }
  0x11   : > { %s803_s7 = smov 4   ;;  %s804_s8 = smov [#allocation5]  }
  0x12   : > { %p608_p12 = pnand %p618_p9, %p607_p11  ;;  %s144_s9 = sshll.u32 %s804_s8, 4  ;;  %s145_s9 = int_to_ptr.vmem [resolvable:$true] %s144_s9 }
  0x13   : > { %167 = sbr.rel (%p879_p10) target bundleno = 310 (0x136), region = 32 }
  0x14   : > { %610 = dma.hbm_to_vmem [thread:$0]  (!%p608_p12), %s129_s27, 1024, %s131_s29, [#allocation3], %s802_s6, %s802_s6, %s803_s7  }
  0x15   : > { %613 = dma.hbm_to_vmem [thread:$0]  (!%p608_p12), %s143_s5, 1024, %s145_s9, [#allocation6], %s802_s6, %s802_s6, %s803_s7  }
  0x18   : > { %774 = dma.done.wait (%p618_p9), [#allocation3], 1024  }
  0x19   : > { %776 = vsyncadd (%p618_p9), [#allocation3], 4294966272 }
  0x1a   : > { %778 = dma.done.wait (%p618_p9), [#allocation6], 1024  }
  0x1b   : > { %780 = vsyncadd (%p618_p9), [#allocation6], 4294966272  ;;  %p196_p13 = scmp.lt.s32.totalorder %s851_s16, 1  ;;  %v805_v0 = vmov 0   ;;  %v806_v1 = vmov 2   ;;  %v596_v3 = vld [vmem:[#allocation5 + $0x38] sm:$0xff]  ;;  %v201_v21 = vlaneseq }
  0x1c   : > { %664 = vset.pattern.permute.xlu0 %v805_v0  ;;  %666 = vset.pattern.permute.xlu1 %v806_v1  ;;  %v588_v4 = vld [vmem:[#allocation2 + $0x38] sm:$0xff]  ;;  %v807_v5 = vmov 1   ;;  %v808_v6 = vmov 3   ;;  %v595_v7 = vld [vmem:[#allocation5 + $0x30] sm:$0xff]  ;;  %v594_v9 = vld [vmem:[#allocation5 + $0x28] sm:$0xff]  ;;  %v809_v26 = vmov 0.0  }
  0x1d   : > { %s197_s10 = scalar_select %p196_p13, %s851_s16, 1  ;;  %326 = vmatpush.bf16.msra.mxu0 %v596_v3  ;;  %387 = vmatpush.bf16.msra.mxu1 %v588_v4  ;;  %v587_v8 = vld [vmem:[#allocation2 + $0x30] sm:$0xff]  ;;  %v586_v10 = vld [vmem:[#allocation2 + $0x28] sm:$0xff]  ;;  %v593_v11 = vld [vmem:[#allocation5 + $0x20] sm:$0xff]  ;;  %v202_v23 = vand.u32 127, %v201_v21 }
  0x1e   : > { %v585_v12 = vld [vmem:[#allocation2 + $0x20] sm:$0xff]  ;;  %v592_v13 = vld [vmem:[#allocation5 + $0x18] sm:$0xff]  ;;  %v591_v15 = vld [vmem:[#allocation5 + $0x10] sm:$0xff]  ;;  %s193_s24 = sand.u32 1, %s791_s13   ;;  %s578_s26 = sshll.u32 %s851_s16, 3 }
  0x1f   : > { %s508_s11 = sshll.u32 %s197_s10, 3  ;;  %v584_v14 = vld [vmem:[#allocation2 + $0x18] sm:$0xff]  ;;  %v583_v16 = vld [vmem:[#allocation2 + $0x10] sm:$0xff]  ;;  %v590_v17 = vld [vmem:[#allocation5 + $0x8] sm:$0xff]  ;;  %s507_s25 = sshll.u32 %s193_s24, 3 }
  0x20   : > { %s199_s20 = scalar_lea.vmem %s940_s0, %s508_s11  ;;  %v582_v18 = vld [vmem:[#allocation2 + $0x8] sm:$0xff]  ;;  %v589_v19 = vld [vmem:[#allocation5] sm:$0xff]  ;;  %s413_s29 = scalar_lea.hbm %s943_s3, %s578_s26 }
  0x21   : > { %v200_v2 = vld [vmem:[%s199_s20] sm:$0xff]  ;;  %327 = vmatpush.bf16.msra.mxu0 %v595_v7  ;;  %388 = vmatpush.bf16.msra.mxu1 %v587_v8  ;;  %s195_s30 = scalar_lea.vmem [#allocation7], %s507_s25  ;;  %s417_s5 = sshll.u32 %s413_s29, 4  ;;  %s418_s5 = int_to_ptr.hbm [resolvable:$true] %s417_s5 }
  0x22   : > { %204 = vperm.xlu0 %664, %v200_v2   ;;  %225 = vperm.xlu1 %666, %v200_v2   ;;  %v581_v20 = vld [vmem:[#allocation2] sm:$0xff]  ;;  %s415_s4 = sshll.u32 %s195_s30, 4  ;;  %s403_s6 = scalar_lea.sflag [#allocation4], %s193_s24  ;;  %s416_s4 = int_to_ptr.vmem [resolvable:$true] %s415_s4 }
  0x23   : > { %s743_s7 = sshra.s32 %s418_s5, 4  ;;  %s749_s10 = scalar_lea.hbm %s943_s3, 16  ;;  %s744_s7 = int_to_ptr.hbm [resolvable:$true] %s743_s7 }
  0x24   : > { %s745_s8 = scalar_lea.hbm %s744_s7, 8  ;;  %p750_p3 = scmp.lt.s32.totalorder %s744_s7, %s943_s3 }
  0x25   : > { %328 = vmatpush.bf16.msra.mxu0 %v594_v9  ;;  %389 = vmatpush.bf16.msra.mxu1 %v586_v10  ;;  %p746_p0 = scmp.ne.s32.totalorder %s744_s7, %s745_s8  ;;  %p751_p4 = scmp.lt.s32.totalorder %s749_s10, %s745_s8 }
  0x27   : > { %p747_p1 = pnand %p746_p0, %p868_p5  ;;  %p752_p7 = por %p751_p4, %p750_p3 }
  0x29   : > { %329 = vmatpush.bf16.msra.mxu0 %v593_v11  ;;  %390 = vmatpush.bf16.msra.mxu1 %v585_v12  ;;  %p748_p2 = pneg %p747_p1 }
  0x2a   : > { %665 = vset.pattern.permute.xlu0 %v807_v5  ;;  %667 = vset.pattern.permute.xlu1 %v808_v6 }
  0x2b   : > { %214 = vperm.xlu0 %665, %v200_v2   ;;  %236 = vperm.xlu1 %667, %v200_v2   ;;  %p753_p8 = pnand %p752_p7, %p748_p2 }
  0x2d   : > { %330 = vmatpush.bf16.msra.mxu0 %v592_v13  ;;  %391 = vmatpush.bf16.msra.mxu1 %v584_v14 }
  0x31   : > { %331 = vmatpush.bf16.msra.mxu0 %v591_v15  ;;  %392 = vmatpush.bf16.msra.mxu1 %v583_v16 }
  0x33   : > { %668 = vset.pattern.permute.xlu0 %v808_v6 }
  0x35   : > { %332 = vmatpush.bf16.msra.mxu0 %v590_v17  ;;  %393 = vmatpush.bf16.msra.mxu1 %v582_v18 }
  0x39   : > { %333 = vmatpush.bf16.msra.mxu0 %v589_v19  ;;  %394 = vmatpush.bf16.msra.mxu1 %v581_v20 }
  0x94   : > { %v205_v22 = vpop.permute.xlu0 %204  ;;  %v226_v24 = vpop.permute.xlu1 %225 }
  0x95   : > { %vm206_vm0 = vcmp.eq.s32.totalorder %v205_v22, %v202_v23  ;;  %vm227_vm2 = vcmp.eq.s32.totalorder %v226_v24, %v202_v23 }
  0x96   : > { %v509_v27 = vsel %vm206_vm0, 1.0, %v809_v26  ;;  %v511_v33 = vsel %vm227_vm2, 1.0, %v809_v26 }
  0x9d   : > { %v215_v25 = vpop.permute.xlu0 %214  ;;  %v237_v31 = vpop.permute.xlu1 %236 }
  0x9e   : > { %vm216_vm1 = vcmp.eq.s32.totalorder %v215_v25, %v202_v23  ;;  %vm238_vm3 = vcmp.eq.s32.totalorder %v237_v31, %v202_v23 }
  0x9f   : > { %v510_v28 = vsel %vm216_vm1, 1.0, %v809_v26  ;;  %v512_v36 = vsel %vm238_vm3, 1.0, %v809_v26 }
  0xa0   : > { %v222_v29 = vadd.f32 %v510_v28, %v509_v27 }
  0xa2   : > { %v223_v30 = vpack.c.bf16 %v222_v29, %v222_v29 }
  0xa4   : > { %v231_v32 = vunpack.c.l.bf16 %v223_v30 }
  0xa6   : > { %v233_v34 = vadd.f32 %v511_v33, %v231_v32 }
  0xa8   : > { %v234_v35 = vpack.c.bf16 %v233_v34, %v233_v34 }
  0xaa   : > { %v242_v37 = vunpack.c.l.bf16 %v234_v35 }
  0xac   : > { %v244_v38 = vadd.f32 %v512_v36, %v242_v37 }
  0xae   : > { %v245_v39 = vpack.c.bf16 %v244_v38, %v244_v38 }
  0xb0   : > { %334 = vmatmul.bf16.vlgmr.msra.gmra.mxu0 %v245_v39  ;;  %395 = vmatmul.bf16.vlgmr.msra.gmra.mxu1 %v245_v39 }
 0x12d   : > { %v335_v40 = vpop.f32.mrf.mxu0  ;;  %v396_v41 = vpop.f32.mrf.mxu1 }
 0x12e   : > { %v397_v42 = vadd.f32 %v396_v41, %v335_v40 }
 0x130   : > { %v400_v43 = vmul.f32 0.25, %v397_v42 }
 0x132   : > { %401 = vst [vmem:[%s195_s30] sm:$0xff] %v400_v43 }
 0x133   : > { %756 = shalt.err (!%p753_p8)
}
 0x134   : > { %605 = dma.vmem_to_hbm [thread:$0]  (%p868_p5), %s416_s4, 128, %s418_s5, %s403_s6  }
 0x135   : > { %v337_v44 = vpop.f32.mrf.mxu0  ;;  %v398_v45 = vpop.f32.mrf.mxu1 }
 0x136 PF: > { %p622_p9 = scmp.ge.s32.totalorder %s799_s15, 2  ;;  %s429_s19 = sand.u32 1, %s787_s12  }
 0x137   : > { %s430_s20 = scalar_lea.sflag [#allocation4], %s429_s19 }
 0x138   : > { %p615_p10 = pnand %p622_p9, %p872_p6 }
 0x13a   : > { %p616_p11 = pneg %p615_p10 }
 0x13c   : > { %782 = dma.done.wait (%p616_p11), %s430_s20, 128  }
 0x13d   : > { %784 = vsyncadd (%p616_p11), %s430_s20, 4294967168  ;;  %p15_p5 = scmp.ge.s32.totalorder %s855_s18, 4   ;;  %s947_s12 = smov %s791_s13 }
 0x13e   : > { %s948_s13 = smov %s795_s14  ;;  %s949_s14 = smov %s866_s21 }
 0x13f   : > { %s950_s15 = smov %s855_s18  ;;  %17 = sbr.rel (!%p15_p5) target bundleno = 5 (0x5), region = 76 }
 0x144   :  { %436 = vsyncpa [#allocation3], 1 }
 0x145   :  { %438 = vsyncpa [#allocation3 + $0x1], 1 }
 0x146   :  { %439 = vsyncpa [#allocation6], 1 }
 0x147   :  { %440 = vsyncpa [#allocation4], 1 }
 0x148   :  { %442 = vsyncpa [#allocation4 + $0x1], 1 }

</bundles_post_ra>
